<compile_context>
chip_gen: v5e
topology: v5e:2x2
jax: 0.10.0
libtpu: 0.0.40
codegen_flags: <defaults>
</compile_context>

<pallas_src>
import jax
import jax.numpy as jnp
from jax.experimental import pallas as pl
from jax.experimental.pallas import tpu as pltpu


def _gcb_kernel(x_ref, wm_ref,
                w1a_ref, b1a_ref, ga_ref, bea_ref, w2a_ref, b2a_ref,
                w1m_ref, b1m_ref, gm_ref, bem_ref, w2m_ref, b2m_ref,
                o_ref):
    TB = x_ref.shape[0]
    wm = wm_ref[...]                                         # (1, C)

    # ---- spatial_pool (pool == 'att'), one batch element at a time ----
    # conv_mask bias cancels under the softmax -> dropped (see reference).
    ctx_list = []
    for t in range(TB):
        xt = x_ref[t].astype(jnp.float32)                    # (C, HW)
        logits = jnp.dot(wm, xt,
                         preferred_element_type=jnp.float32)  # (1, HW)
        m = jnp.max(logits, axis=-1, keepdims=True)
        e = jnp.exp(logits - m)                               # (1, HW)
        s = jnp.sum(e, axis=-1, keepdims=True)                # (1, 1)
        inv_s = pl.reciprocal(s, approx=False)                # exact: one scalar
        # un-normalized context on the MXU (contract HW of both operands),
        # then scale by the scalar 1/sum(e).
        ctx_t = jax.lax.dot_general(
            xt, e, (((1,), (1,)), ((), ())),
            preferred_element_type=jnp.float32) * inv_s       # (C, 1)
        ctx_list.append(ctx_t)
    ctx_cols = ctx_list[0] if TB == 1 else jnp.concatenate(ctx_list, axis=1)
    ctx_rows = jnp.transpose(ctx_cols)                        # (TB, C) lane-dense

    # ---- 1x1-conv bottleneck, batched over TB rows (lane-dense) ----
    # Conv(C->P) -> LayerNorm([P,1,1]) -> ReLU -> Conv(P->C)
    def bottleneck(w1t_ref, b1_ref, g_ref, be_ref, w2t_ref, b2_ref):
        h = jnp.dot(ctx_rows, w1t_ref[...],
                    preferred_element_type=jnp.float32) + b1_ref[...]   # (TB, P)
        p = h.shape[-1]
        mu = jnp.sum(h, axis=-1, keepdims=True) * (1.0 / p)
        d = h - mu
        var = jnp.sum(d * d, axis=-1, keepdims=True) * (1.0 / p)
        hn = d * jax.lax.rsqrt(var + 1e-5)
        hn = hn * g_ref[...] + be_ref[...]
        hn = jnp.maximum(hn, 0.0)
        return jnp.dot(hn, w2t_ref[...],
                       preferred_element_type=jnp.float32) + b2_ref[...]  # (TB, C)

    add_rows = bottleneck(w1a_ref, b1a_ref, ga_ref, bea_ref, w2a_ref, b2a_ref)
    mul_rows = jax.nn.sigmoid(
        bottleneck(w1m_ref, b1m_ref, gm_ref, bem_ref, w2m_ref, b2m_ref))

    # single small XLU transpose back to per-channel columns
    add_cols = jnp.transpose(add_rows)                        # (C, TB)
    mul_cols = jnp.transpose(mul_rows)                        # (C, TB)

    # ---- fuse: out = x * sigmoid(channel_mul(ctx)) + channel_add(ctx) ----
    for t in range(TB):
        xt = x_ref[t].astype(jnp.float32)
        o_ref[t] = (xt * mul_cols[:, t:t + 1]
                    + add_cols[:, t:t + 1]).astype(o_ref.dtype)


def _pick_batch_block(B, max_tb=8):
    divisors = [tb for tb in range(1, min(B, max_tb) + 1) if B % tb == 0]
    # prefer keeping >= 2 grid steps (megacore on v7x), then the largest block
    good = [tb for tb in divisors if B // tb >= 2]
    return max(good) if good else max(divisors)


def spatial_context_block_2d(x, params, *, batch_block=None):
    B, C, H, W = x.shape
    HW = H * W
    xf = x.reshape(B, C, HW)
    P = params['add_w1'].shape[0]

    TB = _pick_batch_block(B) if batch_block is None else batch_block
    assert B % TB == 0

    f32 = jnp.float32
    weights = (
        params['w_mask'].reshape(1, C).astype(f32),
        # channel_add: weights pre-transposed for lane-dense matmuls
        params['add_w1'].T.astype(f32),                # (C, P)
        params['add_b1'].reshape(1, P).astype(f32),
        params['add_gamma'].reshape(1, P).astype(f32),
        params['add_beta'].reshape(1, P).astype(f32),
        params['add_w2'].T.astype(f32),                # (P, C)
        params['add_b2'].reshape(1, C).astype(f32),
        # channel_mul
        params['mul_w1'].T.astype(f32),
        params['mul_b1'].reshape(1, P).astype(f32),
        params['mul_gamma'].reshape(1, P).astype(f32),
        params['mul_beta'].reshape(1, P).astype(f32),
        params['mul_w2'].T.astype(f32),
        params['mul_b2'].reshape(1, C).astype(f32),
    )

    def full_spec(a):
        nd = a.ndim
        return pl.BlockSpec(a.shape, lambda b, _nd=nd: (0,) * _nd)

    in_specs = [pl.BlockSpec((TB, C, HW), lambda b: (b, 0, 0))] + \
               [full_spec(w) for w in weights]
    out_spec = pl.BlockSpec((TB, C, HW), lambda b: (b, 0, 0))

    # Explicit VMEM budget: double-buffered in + out tiles, resident weights,
    # plus slack. Default scoped limits (16/32 MiB) are too small for big C*HW.
    itemsize = jnp.dtype(x.dtype).itemsize
    tile_bytes = TB * C * HW * itemsize
    weight_bytes = sum(int(w.size) * 4 for w in weights)
    vmem_limit = int(min(96 * 1024 * 1024,
                         max(8 * 1024 * 1024,
                             4 * tile_bytes + 2 * weight_bytes + 2 * 1024 * 1024)))

    out = pl.pallas_call(
        _gcb_kernel,
        out_shape=jax.ShapeDtypeStruct((B, C, HW), x.dtype),
        grid_spec=pltpu.PrefetchScalarGridSpec(
            num_scalar_prefetch=0,
            grid=(B // TB,),
            in_specs=in_specs,
            out_specs=out_spec,
        ),
        compiler_params=pltpu.CompilerParams(
            dimension_semantics=("parallel",),
            vmem_limit_bytes=vmem_limit),
    )(xf, *weights)
    return out.reshape(B, C, H, W)


def reference_forward(x, params):
    """Plain-JAX reference mirroring the PyTorch forward exactly (incl. conv_mask bias)."""
    B, C, H, W = x.shape
    xf = x.reshape(B, C, H * W)
    logits = jnp.einsum('oc,bcs->bos', params['w_mask'], xf) \
        + params['b_mask'][None, :, None]                       # (B, 1, HW)
    p = jax.nn.softmax(logits, axis=2)
    ctx = jnp.einsum('bcs,bos->bc', xf, p)                       # (B, C)

    def bottleneck(c, w1, b1, g, be, w2, b2):
        h = c @ w1.T + b1                                        # (B, P)
        mu = h.mean(-1, keepdims=True)
        var = ((h - mu) ** 2).mean(-1, keepdims=True)
        hn = (h - mu) / jnp.sqrt(var + 1e-5) * g + be
        hn = jnp.maximum(hn, 0.0)
        return hn @ w2.T + b2                                    # (B, C)

    add_t = bottleneck(ctx, params['add_w1'], params['add_b1'],
                       params['add_gamma'], params['add_beta'],
                       params['add_w2'], params['add_b2'])
    mul_t = jax.nn.sigmoid(
        bottleneck(ctx, params['mul_w1'], params['mul_b1'],
                   params['mul_gamma'], params['mul_beta'],
                   params['mul_w2'], params['mul_b2']))
    return x * mul_t[:, :, None, None] + add_t[:, :, None, None]


def init_params(key, inplanes, planes):
    ks = jax.random.split(key, 10)
    s = 0.1
    return {
        # conv_mask: Conv2d(inplanes, 1, 1)
        'w_mask': s * jax.random.normal(ks[0], (1, inplanes), jnp.float32),
        'b_mask': s * jax.random.normal(ks[1], (1,), jnp.float32),
        # channel_add_conv
        'add_w1': s * jax.random.normal(ks[2], (planes, inplanes), jnp.float32),
        'add_b1': s * jax.random.normal(ks[3], (planes,), jnp.float32),
        'add_gamma': jnp.ones((planes,), jnp.float32),
        'add_beta': jnp.zeros((planes,), jnp.float32),
        'add_w2': s * jax.random.normal(ks[4], (inplanes, planes), jnp.float32),
        'add_b2': s * jax.random.normal(ks[5], (inplanes,), jnp.float32),
        # channel_mul_conv
        'mul_w1': s * jax.random.normal(ks[6], (planes, inplanes), jnp.float32),
        'mul_b1': s * jax.random.normal(ks[7], (planes,), jnp.float32),
        'mul_gamma': jnp.ones((planes,), jnp.float32),
        'mul_beta': jnp.zeros((planes,), jnp.float32),
        'mul_w2': s * jax.random.normal(ks[8], (inplanes, planes), jnp.float32),
        'mul_b2': s * jax.random.normal(ks[9], (inplanes,), jnp.float32),
    }


if __name__ == "__main__":
    B, C, P, H, W = 4, 8, 4, 16, 16          # inplanes=8, planes=4; TB=2, grid=2
    key = jax.random.PRNGKey(0)
    kx, kp = jax.random.split(key)
    x = jax.random.normal(kx, (B, C, H, W), jnp.float32)
    params = init_params(kp, C, P)

    out = spatial_context_block_2d(x, params)
    out = jax.block_until_ready(out)

    ref = reference_forward(x, params)
    assert out.shape == (B, C, H, W)
    assert jnp.allclose(out, ref, atol=1e-5, rtol=1e-5), "mismatch vs reference"

    print("KERNEL_OK")
</pallas_src>

<mosaic_0001>
module attributes {stable_mosaic.version = 11 : i64} {
  func.func @_gcb_kernel(%arg0: i32, %arg1: memref<2x8x256xf32, #tpu.memory_space<vmem>>, %arg2: memref<1x8xf32, #tpu.memory_space<vmem>>, %arg3: memref<8x4xf32, #tpu.memory_space<vmem>>, %arg4: memref<1x4xf32, #tpu.memory_space<vmem>>, %arg5: memref<1x4xf32, #tpu.memory_space<vmem>>, %arg6: memref<1x4xf32, #tpu.memory_space<vmem>>, %arg7: memref<4x8xf32, #tpu.memory_space<vmem>>, %arg8: memref<1x8xf32, #tpu.memory_space<vmem>>, %arg9: memref<8x4xf32, #tpu.memory_space<vmem>>, %arg10: memref<1x4xf32, #tpu.memory_space<vmem>>, %arg11: memref<1x4xf32, #tpu.memory_space<vmem>>, %arg12: memref<1x4xf32, #tpu.memory_space<vmem>>, %arg13: memref<4x8xf32, #tpu.memory_space<vmem>>, %arg14: memref<1x8xf32, #tpu.memory_space<vmem>>, %arg15: memref<2x8x256xf32, #tpu.memory_space<vmem>>) attributes {dimension_semantics = [#tpu.dimension_semantics<parallel>], iteration_bounds = array<i64: 2>, scalar_prefetch = 0 : i64, scratch_operands = 0 : i64, tpu.core_type = #tpu.core_type<tc>, window_params = [{transform_indices = @transform_0, window_bounds = array<i64: 2, 8, 256>}, {pipeline_mode = #tpu.pipeline_mode<synchronous>, transform_indices = @transform_1, window_bounds = array<i64: 1, 8>}, {pipeline_mode = #tpu.pipeline_mode<synchronous>, transform_indices = @transform_2, window_bounds = array<i64: 8, 4>}, {pipeline_mode = #tpu.pipeline_mode<synchronous>, transform_indices = @transform_3, window_bounds = array<i64: 1, 4>}, {pipeline_mode = #tpu.pipeline_mode<synchronous>, transform_indices = @transform_4, window_bounds = array<i64: 1, 4>}, {pipeline_mode = #tpu.pipeline_mode<synchronous>, transform_indices = @transform_5, window_bounds = array<i64: 1, 4>}, {pipeline_mode = #tpu.pipeline_mode<synchronous>, transform_indices = @transform_6, window_bounds = array<i64: 4, 8>}, {pipeline_mode = #tpu.pipeline_mode<synchronous>, transform_indices = @transform_7, window_bounds = array<i64: 1, 8>}, {pipeline_mode = #tpu.pipeline_mode<synchronous>, transform_indices = @transform_8, window_bounds = array<i64: 8, 4>}, {pipeline_mode = #tpu.pipeline_mode<synchronous>, transform_indices = @transform_9, window_bounds = array<i64: 1, 4>}, {pipeline_mode = #tpu.pipeline_mode<synchronous>, transform_indices = @transform_10, window_bounds = array<i64: 1, 4>}, {pipeline_mode = #tpu.pipeline_mode<synchronous>, transform_indices = @transform_11, window_bounds = array<i64: 1, 4>}, {pipeline_mode = #tpu.pipeline_mode<synchronous>, transform_indices = @transform_12, window_bounds = array<i64: 4, 8>}, {pipeline_mode = #tpu.pipeline_mode<synchronous>, transform_indices = @transform_13, window_bounds = array<i64: 1, 8>}, {transform_indices = @transform_14, window_bounds = array<i64: 2, 8, 256>}]} {
    %c0 = arith.constant 0 : index
    %c0_0 = arith.constant 0 : index
    %0 = vector.load %arg2[%c0, %c0_0] : memref<1x8xf32, #tpu.memory_space<vmem>>, vector<1x8xf32>
    %c0_1 = arith.constant 0 : index
    %c0_2 = arith.constant 0 : index
    %c0_3 = arith.constant 0 : index
    %1 = vector.load %arg1[%c0_1, %c0_2, %c0_3] : memref<2x8x256xf32, #tpu.memory_space<vmem>>, vector<1x8x256xf32>
    %2 = vector.shape_cast %1 : vector<1x8x256xf32> to vector<8x256xf32>
    %cst = arith.constant dense<0.000000e+00> : vector<1x256xf32>
    %3 = tpu.matmul %0, %2, %cst {dimension_numbers = #tpu.dot_dimension_numbers<[1], [0], [0], [1], [0, 0, 1, 1], [], []>} : vector<1x8xf32>, vector<8x256xf32>, vector<1x256xf32> -> vector<1x256xf32>
    %cst_4 = arith.constant dense<0xFF800000> : vector<1xf32>
    %4 = vector.multi_reduction <maximumf>, %3, %cst_4 [1] : vector<1x256xf32> to vector<1xf32>
    %5 = vector.shape_cast %4 : vector<1xf32> to vector<1x1xf32>
    %6 = vector.broadcast %5 : vector<1x1xf32> to vector<1x256xf32>
    %7 = arith.subf %3, %6 : vector<1x256xf32>
    %8 = math.exp %7 : vector<1x256xf32>
    %cst_5 = arith.constant dense<0.000000e+00> : vector<1xf32>
    %9 = vector.multi_reduction <add>, %8, %cst_5 [1] : vector<1x256xf32> to vector<1xf32>
    %10 = vector.shape_cast %9 : vector<1xf32> to vector<1x1xf32>
    %11 = tpu.reciprocal %10 : vector<1x1xf32> -> vector<1x1xf32>
    %cst_6 = arith.constant dense<0.000000e+00> : vector<8x1xf32>
    %12 = tpu.matmul %2, %8, %cst_6 {dimension_numbers = #tpu.dot_dimension_numbers<[1], [1], [0], [0], [0, 0, 1, 0], [], []>} : vector<8x256xf32>, vector<1x256xf32>, vector<8x1xf32> -> vector<8x1xf32>
    %13 = vector.broadcast %11 : vector<1x1xf32> to vector<8x1xf32>
    %14 = arith.mulf %12, %13 : vector<8x1xf32>
    %c1 = arith.constant 1 : index
    %c0_7 = arith.constant 0 : index
    %c0_8 = arith.constant 0 : index
    %15 = vector.load %arg1[%c1, %c0_7, %c0_8] : memref<2x8x256xf32, #tpu.memory_space<vmem>>, vector<1x8x256xf32>
    %16 = vector.shape_cast %15 : vector<1x8x256xf32> to vector<8x256xf32>
    %cst_9 = arith.constant dense<0.000000e+00> : vector<1x256xf32>
    %17 = tpu.matmul %0, %16, %cst_9 {dimension_numbers = #tpu.dot_dimension_numbers<[1], [0], [0], [1], [0, 0, 1, 1], [], []>} : vector<1x8xf32>, vector<8x256xf32>, vector<1x256xf32> -> vector<1x256xf32>
    %cst_10 = arith.constant dense<0xFF800000> : vector<1xf32>
    %18 = vector.multi_reduction <maximumf>, %17, %cst_10 [1] : vector<1x256xf32> to vector<1xf32>
    %19 = vector.shape_cast %18 : vector<1xf32> to vector<1x1xf32>
    %20 = vector.broadcast %19 : vector<1x1xf32> to vector<1x256xf32>
    %21 = arith.subf %17, %20 : vector<1x256xf32>
    %22 = math.exp %21 : vector<1x256xf32>
    %cst_11 = arith.constant dense<0.000000e+00> : vector<1xf32>
    %23 = vector.multi_reduction <add>, %22, %cst_11 [1] : vector<1x256xf32> to vector<1xf32>
    %24 = vector.shape_cast %23 : vector<1xf32> to vector<1x1xf32>
    %25 = tpu.reciprocal %24 : vector<1x1xf32> -> vector<1x1xf32>
    %cst_12 = arith.constant dense<0.000000e+00> : vector<8x1xf32>
    %26 = tpu.matmul %16, %22, %cst_12 {dimension_numbers = #tpu.dot_dimension_numbers<[1], [1], [0], [0], [0, 0, 1, 0], [], []>} : vector<8x256xf32>, vector<1x256xf32>, vector<8x1xf32> -> vector<8x1xf32>
    %27 = vector.broadcast %25 : vector<1x1xf32> to vector<8x1xf32>
    %28 = arith.mulf %26, %27 : vector<8x1xf32>
    %29 = tpu.concatenate %14, %28 in 1 : vector<8x1xf32>, vector<8x1xf32> -> vector<8x2xf32>
    %30 = tpu.transpose %29, [1, 0] : vector<8x2xf32> -> vector<2x8xf32>
    %c0_13 = arith.constant 0 : index
    %c0_14 = arith.constant 0 : index
    %31 = vector.load %arg3[%c0_13, %c0_14] : memref<8x4xf32, #tpu.memory_space<vmem>>, vector<8x4xf32>
    %cst_15 = arith.constant dense<0.000000e+00> : vector<2x4xf32>
    %32 = tpu.matmul %30, %31, %cst_15 {dimension_numbers = #tpu.dot_dimension_numbers<[1], [0], [0], [1], [0, 0, 1, 1], [], []>} : vector<2x8xf32>, vector<8x4xf32>, vector<2x4xf32> -> vector<2x4xf32>
    %c0_16 = arith.constant 0 : index
    %c0_17 = arith.constant 0 : index
    %33 = vector.load %arg4[%c0_16, %c0_17] : memref<1x4xf32, #tpu.memory_space<vmem>>, vector<1x4xf32>
    %34 = vector.broadcast %33 : vector<1x4xf32> to vector<2x4xf32>
    %35 = arith.addf %32, %34 : vector<2x4xf32>
    %cst_18 = arith.constant dense<0.000000e+00> : vector<2xf32>
    %36 = vector.multi_reduction <add>, %35, %cst_18 [1] : vector<2x4xf32> to vector<2xf32>
    %37 = vector.shape_cast %36 : vector<2xf32> to vector<2x1xf32>
    %cst_19 = arith.constant 2.500000e-01 : f32
    %38 = vector.broadcast %cst_19 : f32 to vector<2x1xf32>
    %39 = arith.mulf %37, %38 : vector<2x1xf32>
    %40 = vector.broadcast %39 : vector<2x1xf32> to vector<2x4xf32>
    %41 = arith.subf %35, %40 : vector<2x4xf32>
    %42 = arith.mulf %41, %41 : vector<2x4xf32>
    %cst_20 = arith.constant dense<0.000000e+00> : vector<2xf32>
    %43 = vector.multi_reduction <add>, %42, %cst_20 [1] : vector<2x4xf32> to vector<2xf32>
    %44 = vector.shape_cast %43 : vector<2xf32> to vector<2x1xf32>
    %cst_21 = arith.constant 2.500000e-01 : f32
    %45 = vector.broadcast %cst_21 : f32 to vector<2x1xf32>
    %46 = arith.mulf %44, %45 : vector<2x1xf32>
    %cst_22 = arith.constant 9.99999974E-6 : f32
    %47 = vector.broadcast %cst_22 : f32 to vector<2x1xf32>
    %48 = arith.addf %46, %47 : vector<2x1xf32>
    %49 = math.rsqrt %48 : vector<2x1xf32>
    %50 = vector.broadcast %49 : vector<2x1xf32> to vector<2x4xf32>
    %51 = arith.mulf %41, %50 : vector<2x4xf32>
    %c0_23 = arith.constant 0 : index
    %c0_24 = arith.constant 0 : index
    %52 = vector.load %arg5[%c0_23, %c0_24] : memref<1x4xf32, #tpu.memory_space<vmem>>, vector<1x4xf32>
    %53 = vector.broadcast %52 : vector<1x4xf32> to vector<2x4xf32>
    %54 = arith.mulf %51, %53 : vector<2x4xf32>
    %c0_25 = arith.constant 0 : index
    %c0_26 = arith.constant 0 : index
    %55 = vector.load %arg6[%c0_25, %c0_26] : memref<1x4xf32, #tpu.memory_space<vmem>>, vector<1x4xf32>
    %56 = vector.broadcast %55 : vector<1x4xf32> to vector<2x4xf32>
    %57 = arith.addf %54, %56 : vector<2x4xf32>
    %cst_27 = arith.constant 0.000000e+00 : f32
    %58 = vector.broadcast %cst_27 : f32 to vector<2x4xf32>
    %59 = arith.maximumf %57, %58 : vector<2x4xf32>
    %c0_28 = arith.constant 0 : index
    %c0_29 = arith.constant 0 : index
    %60 = vector.load %arg7[%c0_28, %c0_29] : memref<4x8xf32, #tpu.memory_space<vmem>>, vector<4x8xf32>
    %cst_30 = arith.constant dense<0.000000e+00> : vector<2x8xf32>
    %61 = tpu.matmul %59, %60, %cst_30 {dimension_numbers = #tpu.dot_dimension_numbers<[1], [0], [0], [1], [0, 0, 1, 1], [], []>} : vector<2x4xf32>, vector<4x8xf32>, vector<2x8xf32> -> vector<2x8xf32>
    %c0_31 = arith.constant 0 : index
    %c0_32 = arith.constant 0 : index
    %62 = vector.load %arg8[%c0_31, %c0_32] : memref<1x8xf32, #tpu.memory_space<vmem>>, vector<1x8xf32>
    %63 = vector.broadcast %62 : vector<1x8xf32> to vector<2x8xf32>
    %64 = arith.addf %61, %63 : vector<2x8xf32>
    %c0_33 = arith.constant 0 : index
    %c0_34 = arith.constant 0 : index
    %65 = vector.load %arg9[%c0_33, %c0_34] : memref<8x4xf32, #tpu.memory_space<vmem>>, vector<8x4xf32>
    %cst_35 = arith.constant dense<0.000000e+00> : vector<2x4xf32>
    %66 = tpu.matmul %30, %65, %cst_35 {dimension_numbers = #tpu.dot_dimension_numbers<[1], [0], [0], [1], [0, 0, 1, 1], [], []>} : vector<2x8xf32>, vector<8x4xf32>, vector<2x4xf32> -> vector<2x4xf32>
    %c0_36 = arith.constant 0 : index
    %c0_37 = arith.constant 0 : index
    %67 = vector.load %arg10[%c0_36, %c0_37] : memref<1x4xf32, #tpu.memory_space<vmem>>, vector<1x4xf32>
    %68 = vector.broadcast %67 : vector<1x4xf32> to vector<2x4xf32>
    %69 = arith.addf %66, %68 : vector<2x4xf32>
    %cst_38 = arith.constant dense<0.000000e+00> : vector<2xf32>
    %70 = vector.multi_reduction <add>, %69, %cst_38 [1] : vector<2x4xf32> to vector<2xf32>
    %71 = vector.shape_cast %70 : vector<2xf32> to vector<2x1xf32>
    %cst_39 = arith.constant 2.500000e-01 : f32
    %72 = vector.broadcast %cst_39 : f32 to vector<2x1xf32>
    %73 = arith.mulf %71, %72 : vector<2x1xf32>
    %74 = vector.broadcast %73 : vector<2x1xf32> to vector<2x4xf32>
    %75 = arith.subf %69, %74 : vector<2x4xf32>
    %76 = arith.mulf %75, %75 : vector<2x4xf32>
    %cst_40 = arith.constant dense<0.000000e+00> : vector<2xf32>
    %77 = vector.multi_reduction <add>, %76, %cst_40 [1] : vector<2x4xf32> to vector<2xf32>
    %78 = vector.shape_cast %77 : vector<2xf32> to vector<2x1xf32>
    %cst_41 = arith.constant 2.500000e-01 : f32
    %79 = vector.broadcast %cst_41 : f32 to vector<2x1xf32>
    %80 = arith.mulf %78, %79 : vector<2x1xf32>
    %cst_42 = arith.constant 9.99999974E-6 : f32
    %81 = vector.broadcast %cst_42 : f32 to vector<2x1xf32>
    %82 = arith.addf %80, %81 : vector<2x1xf32>
    %83 = math.rsqrt %82 : vector<2x1xf32>
    %84 = vector.broadcast %83 : vector<2x1xf32> to vector<2x4xf32>
    %85 = arith.mulf %75, %84 : vector<2x4xf32>
    %c0_43 = arith.constant 0 : index
    %c0_44 = arith.constant 0 : index
    %86 = vector.load %arg11[%c0_43, %c0_44] : memref<1x4xf32, #tpu.memory_space<vmem>>, vector<1x4xf32>
    %87 = vector.broadcast %86 : vector<1x4xf32> to vector<2x4xf32>
    %88 = arith.mulf %85, %87 : vector<2x4xf32>
    %c0_45 = arith.constant 0 : index
    %c0_46 = arith.constant 0 : index
    %89 = vector.load %arg12[%c0_45, %c0_46] : memref<1x4xf32, #tpu.memory_space<vmem>>, vector<1x4xf32>
    %90 = vector.broadcast %89 : vector<1x4xf32> to vector<2x4xf32>
    %91 = arith.addf %88, %90 : vector<2x4xf32>
    %cst_47 = arith.constant 0.000000e+00 : f32
    %92 = vector.broadcast %cst_47 : f32 to vector<2x4xf32>
    %93 = arith.maximumf %91, %92 : vector<2x4xf32>
    %c0_48 = arith.constant 0 : index
    %c0_49 = arith.constant 0 : index
    %94 = vector.load %arg13[%c0_48, %c0_49] : memref<4x8xf32, #tpu.memory_space<vmem>>, vector<4x8xf32>
    %cst_50 = arith.constant dense<0.000000e+00> : vector<2x8xf32>
    %95 = tpu.matmul %93, %94, %cst_50 {dimension_numbers = #tpu.dot_dimension_numbers<[1], [0], [0], [1], [0, 0, 1, 1], [], []>} : vector<2x4xf32>, vector<4x8xf32>, vector<2x8xf32> -> vector<2x8xf32>
    %c0_51 = arith.constant 0 : index
    %c0_52 = arith.constant 0 : index
    %96 = vector.load %arg14[%c0_51, %c0_52] : memref<1x8xf32, #tpu.memory_space<vmem>>, vector<1x8xf32>
    %97 = vector.broadcast %96 : vector<1x8xf32> to vector<2x8xf32>
    %98 = arith.addf %95, %97 : vector<2x8xf32>
    %99 = arith.negf %98 : vector<2x8xf32>
    %100 = math.exp %99 : vector<2x8xf32>
    %cst_53 = arith.constant 1.000000e+00 : f32
    %101 = vector.broadcast %cst_53 : f32 to vector<2x8xf32>
    %102 = arith.addf %101, %100 : vector<2x8xf32>
    %103 = arith.divf %101, %102 : vector<2x8xf32>
    %104 = tpu.transpose %64, [1, 0] : vector<2x8xf32> -> vector<8x2xf32>
    %105 = tpu.transpose %103, [1, 0] : vector<2x8xf32> -> vector<8x2xf32>
    %c0_54 = arith.constant 0 : index
    %c0_55 = arith.constant 0 : index
    %c0_56 = arith.constant 0 : index
    %106 = vector.load %arg1[%c0_54, %c0_55, %c0_56] : memref<2x8x256xf32, #tpu.memory_space<vmem>>, vector<1x8x256xf32>
    %107 = vector.shape_cast %106 : vector<1x8x256xf32> to vector<8x256xf32>
    %108 = vector.extract_strided_slice %105 {offsets = [0, 0], sizes = [8, 1], strides = [1, 1]} : vector<8x2xf32> to vector<8x1xf32>
    %109 = vector.broadcast %108 : vector<8x1xf32> to vector<8x256xf32>
    %110 = arith.mulf %107, %109 : vector<8x256xf32>
    %111 = vector.extract_strided_slice %104 {offsets = [0, 0], sizes = [8, 1], strides = [1, 1]} : vector<8x2xf32> to vector<8x1xf32>
    %112 = vector.broadcast %111 : vector<8x1xf32> to vector<8x256xf32>
    %113 = arith.addf %110, %112 : vector<8x256xf32>
    %c0_57 = arith.constant 0 : index
    %c0_58 = arith.constant 0 : index
    %c0_59 = arith.constant 0 : index
    %114 = vector.load %arg15[%c0_57, %c0_58, %c0_59] : memref<2x8x256xf32, #tpu.memory_space<vmem>>, vector<1x8x256xf32>
    %115 = vector.shape_cast %114 : vector<1x8x256xf32> to vector<8x256xf32>
    %116 = vector.shape_cast %113 : vector<8x256xf32> to vector<1x8x256xf32>
    tpu.vector_store %arg15[%c0_57, %c0_58, %c0_59], %116 {strides = array<i32>} : memref<2x8x256xf32, #tpu.memory_space<vmem>>, vector<1x8x256xf32>,
    %c1_60 = arith.constant 1 : index
    %c0_61 = arith.constant 0 : index
    %c0_62 = arith.constant 0 : index
    %117 = vector.load %arg1[%c1_60, %c0_61, %c0_62] : memref<2x8x256xf32, #tpu.memory_space<vmem>>, vector<1x8x256xf32>
    %118 = vector.shape_cast %117 : vector<1x8x256xf32> to vector<8x256xf32>
    %119 = vector.extract_strided_slice %105 {offsets = [0, 1], sizes = [8, 1], strides = [1, 1]} : vector<8x2xf32> to vector<8x1xf32>
    %120 = vector.broadcast %119 : vector<8x1xf32> to vector<8x256xf32>
    %121 = arith.mulf %118, %120 : vector<8x256xf32>
    %122 = vector.extract_strided_slice %104 {offsets = [0, 1], sizes = [8, 1], strides = [1, 1]} : vector<8x2xf32> to vector<8x1xf32>
    %123 = vector.broadcast %122 : vector<8x1xf32> to vector<8x256xf32>
    %124 = arith.addf %121, %123 : vector<8x256xf32>
    %c1_63 = arith.constant 1 : index
    %c0_64 = arith.constant 0 : index
    %c0_65 = arith.constant 0 : index
    %125 = vector.load %arg15[%c1_63, %c0_64, %c0_65] : memref<2x8x256xf32, #tpu.memory_space<vmem>>, vector<1x8x256xf32>
    %126 = vector.shape_cast %125 : vector<1x8x256xf32> to vector<8x256xf32>
    %127 = vector.shape_cast %124 : vector<8x256xf32> to vector<1x8x256xf32>
    tpu.vector_store %arg15[%c1_63, %c0_64, %c0_65], %127 {strides = array<i32>} : memref<2x8x256xf32, #tpu.memory_space<vmem>>, vector<1x8x256xf32>,
    return
  }
  func.func @transform_0(%arg0: i32) -> (i32, i32, i32) {
    %c0_i32 = arith.constant 0 : i32
    %c0_i32_0 = arith.constant 0 : i32
    %c0_i32_1 = arith.constant 0 : i32
    return %arg0, %c0_i32, %c0_i32_0 : i32, i32, i32
  }
  func.func @transform_1(%arg0: i32) -> (i32, i32) {
    %c0_i32 = arith.constant 0 : i32
    %c0_i32_0 = arith.constant 0 : i32
    %c0_i32_1 = arith.constant 0 : i32
    return %c0_i32, %c0_i32_0 : i32, i32
  }
  func.func @transform_2(%arg0: i32) -> (i32, i32) {
    %c0_i32 = arith.constant 0 : i32
    %c0_i32_0 = arith.constant 0 : i32
    %c0_i32_1 = arith.constant 0 : i32
    return %c0_i32, %c0_i32_0 : i32, i32
  }
  func.func @transform_3(%arg0: i32) -> (i32, i32) {
    %c0_i32 = arith.constant 0 : i32
    %c0_i32_0 = arith.constant 0 : i32
    %c0_i32_1 = arith.constant 0 : i32
    return %c0_i32, %c0_i32_0 : i32, i32
  }
  func.func @transform_4(%arg0: i32) -> (i32, i32) {
    %c0_i32 = arith.constant 0 : i32
    %c0_i32_0 = arith.constant 0 : i32
    %c0_i32_1 = arith.constant 0 : i32
    return %c0_i32, %c0_i32_0 : i32, i32
  }
  func.func @transform_5(%arg0: i32) -> (i32, i32) {
    %c0_i32 = arith.constant 0 : i32
    %c0_i32_0 = arith.constant 0 : i32
    %c0_i32_1 = arith.constant 0 : i32
    return %c0_i32, %c0_i32_0 : i32, i32
  }
  func.func @transform_6(%arg0: i32) -> (i32, i32) {
    %c0_i32 = arith.constant 0 : i32
    %c0_i32_0 = arith.constant 0 : i32
    %c0_i32_1 = arith.constant 0 : i32
    return %c0_i32, %c0_i32_0 : i32, i32
  }
  func.func @transform_7(%arg0: i32) -> (i32, i32) {
    %c0_i32 = arith.constant 0 : i32
    %c0_i32_0 = arith.constant 0 : i32
    %c0_i32_1 = arith.constant 0 : i32
    return %c0_i32, %c0_i32_0 : i32, i32
  }
  func.func @transform_8(%arg0: i32) -> (i32, i32) {
    %c0_i32 = arith.constant 0 : i32
    %c0_i32_0 = arith.constant 0 : i32
    %c0_i32_1 = arith.constant 0 : i32
    return %c0_i32, %c0_i32_0 : i32, i32
  }
  func.func @transform_9(%arg0: i32) -> (i32, i32) {
    %c0_i32 = arith.constant 0 : i32
    %c0_i32_0 = arith.constant 0 : i32
    %c0_i32_1 = arith.constant 0 : i32
    return %c0_i32, %c0_i32_0 : i32, i32
  }
  func.func @transform_10(%arg0: i32) -> (i32, i32) {
    %c0_i32 = arith.constant 0 : i32
    %c0_i32_0 = arith.constant 0 : i32
    %c0_i32_1 = arith.constant 0 : i32
    return %c0_i32, %c0_i32_0 : i32, i32
  }
  func.func @transform_11(%arg0: i32) -> (i32, i32) {
    %c0_i32 = arith.constant 0 : i32
    %c0_i32_0 = arith.constant 0 : i32
    %c0_i32_1 = arith.constant 0 : i32
    return %c0_i32, %c0_i32_0 : i32, i32
  }
  func.func @transform_12(%arg0: i32) -> (i32, i32) {
    %c0_i32 = arith.constant 0 : i32
    %c0_i32_0 = arith.constant 0 : i32
    %c0_i32_1 = arith.constant 0 : i32
    return %c0_i32, %c0_i32_0 : i32, i32
  }
  func.func @transform_13(%arg0: i32) -> (i32, i32) {
    %c0_i32 = arith.constant 0 : i32
    %c0_i32_0 = arith.constant 0 : i32
    %c0_i32_1 = arith.constant 0 : i32
    return %c0_i32, %c0_i32_0 : i32, i32
  }
  func.func @transform_14(%arg0: i32) -> (i32, i32, i32) {
    %c0_i32 = arith.constant 0 : i32
    %c0_i32_0 = arith.constant 0 : i32
    %c0_i32_1 = arith.constant 0 : i32
    return %arg0, %c0_i32, %c0_i32_0 : i32, i32, i32
  }
}

</mosaic_0001>

<bundles_post_ra>
// kernel: tpu_custom_call.1
= control target key start
LH: loop header
LB: loop body
LE: loop exit
PB: predicated region body
PF: predicated region fallthrough
CT: control target
= control target key end

     0   :  { %s1593_s0 = inlined_call_operand.hbm [shape: f32[4,8,256], index: 0, kind: input, shape index: {}]   ;;  %s1594_s1 = inlined_call_operand.vmem [shape: f32[1,8], index: 1, kind: input, shape index: {}]   ;;  %s1595_s2 = inlined_call_operand.vmem [shape: f32[8,4], index: 2, kind: input, shape index: {}]   ;;  %s1596_s3 = inlined_call_operand.vmem [shape: f32[1,4], index: 3, kind: input, shape index: {}]   ;;  %s1597_s4 = inlined_call_operand.vmem [shape: f32[1,4], index: 4, kind: input, shape index: {}]   ;;  %s1598_s5 = inlined_call_operand.vmem [shape: f32[1,4], index: 5, kind: input, shape index: {}]   ;;  %s1599_s6 = inlined_call_operand.vmem [shape: f32[4,8], index: 6, kind: input, shape index: {}]   ;;  %s1600_s7 = inlined_call_operand.vmem [shape: f32[1,8], index: 7, kind: input, shape index: {}]   ;;  %s1601_s8 = inlined_call_operand.vmem [shape: f32[8,4], index: 8, kind: input, shape index: {}]   ;;  %s1602_s9 = inlined_call_operand.vmem [shape: f32[1,4], index: 9, kind: input, shape index: {}]   ;;  %s1603_s10 = inlined_call_operand.vmem [shape: f32[1,4], index: 10, kind: input, shape index: {}]   ;;  %s1604_s11 = inlined_call_operand.vmem [shape: f32[1,4], index: 11, kind: input, shape index: {}]   ;;  %s1605_s12 = inlined_call_operand.vmem [shape: f32[4,8], index: 12, kind: input, shape index: {}]   ;;  %s1606_s13 = inlined_call_operand.vmem [shape: f32[1,8], index: 13, kind: input, shape index: {}]   ;;  %s1607_s14 = inlined_call_operand.hbm [shape: f32[4,8,256], index: 14, kind: output, shape index: {}]  }
   0x1   :  { %1617 = sst [smem:[#allocation15_spill]] %s1593_s0 }
   0x2   :  { %1618 = sst [smem:[#allocation16_spill]] %s1594_s1 }
   0x3   :  { %1619 = sst [smem:[#allocation17_spill]] %s1607_s14 }
   0x4   :  { %19 = vsyncpa [#allocation3], 0 }
   0x5   :  { %21 = vsyncpa [#allocation3 + $0x1], 0 }
   0x6   :  { %22 = vsyncpa [#allocation4], 0 }
   0x7   :  { %24 = vsyncpa [#allocation4 + $0x1], 0  ;;  %s1385_s29 = smov 0   ;;  %s1387_s30 = smov 0  }
   0x8   :  { %s1389_s15 = smov 0   ;;  %s1391_s16 = smov 0  }
   0x9 LB: > { %1620 = sst [smem:[#allocation8_spill]] %s1290_s29  ;;  %s1406_s17 = sadd.s32 4294967295, %s1302_s16   ;;  %s1302_s16 = sphi %s1391_s16, %s1640_s16   ;;  %s1298_s15 = sphi %s1389_s15, %s1642_s15   ;;  %s1294_s30 = sphi %s1387_s30, %s1644_s30   ;;  %s1290_s29 = sphi %s1385_s29, %s1643_s29  }
   0xa   : > { %1621 = sst [smem:[#allocation9_spill]] %s1298_s15  ;;  %s1084_s18 = sadd.s32 4294967294, %s1302_s16  }
   0xb   : > { %1622 = sst [smem:[#allocation10_spill]] %s1406_s17  ;;  %s1410_s19 = sadd.s32 1, %s1302_s16  }
   0xc   : > { %1623 = sst [smem:[#allocation11_spill]] %s1410_s19  ;;  %s37_s20 = sadd.s32 1, %s1298_s15 }
   0xd   : > { %s34_s21 = ssub.s32 %s1302_s16, %s1410_s19  ;;  %p44_p0 = scmp.ne.s32.totalorder %s1298_s15, %s1294_s30 }
   0xe   : > { %p35_p1 = scmp.eq.s32.totalorder %s34_s21, 0  ;;  %p45_p2 = scmp.eq.s32.totalorder %s1302_s16, 0 }
   0xf   : > { %p50_p3 = scmp.ne.s32.totalorder %s1294_s30, %s1290_s29  ;;  %p51_p4 = scmp.eq.s32.totalorder %s1406_s17, 0 }
  0x10   : > { %s1422_s22 = scalar_select %p35_p1, %s1298_s15, %s37_s20  }
  0x11   : > { %p1424_p5 = por %p45_p2, %p44_p0  ;;  %p1428_p6 = por %p51_p4, %p50_p3 }
  0x12   : > { %1624 = sst [smem:[#allocation12_spill]] %s1422_s22  ;;  %p347_p7 = scmp.eq.s32.totalorder %s1406_s17, 1 }
  0x13   : > { %p353_p8 = scmp.eq.s32.totalorder %s1084_s18, 1  ;;  %p1133_p10 = scmp.lt.s32.totalorder %s1302_s16, 2 }
  0x14   : > { %p1435_p11 = por %p347_p7, %p44_p0  ;;  %s412_s27 = sand.u32 1, %s1298_s15  }
  0x15   : > { %p1439_p12 = por %p353_p8, %p50_p3  ;;  %s1118_s28 = sshll.u32 %s1302_s16, 5 }
  0x16   : > { %s1627_s25 = scalar_select %p1435_p11, 1, 0 }
  0x17   : > { %s1629_s26 = scalar_select %p1439_p12, 1, 0 }
  0x18   : > { %1628 = sst [smem:[#allocation13_spill]] %s1627_s25  ;;  %s1087_s20 = sshll.u32 %s412_s27, 5 }
  0x19   : > { %1630 = sst [smem:[#allocation14_spill]] %s1629_s26  ;;  %s416_s18 = scalar_lea.vmem [#allocation2], %s1087_s20 }
  0x1a   : > { %s1631_s0 = sld [smem:[#allocation15_spill]]  ;;  %s425_s14 = sshll.u32 %s416_s18, 4  ;;  %s426_s14 = int_to_ptr.vmem [resolvable:$true] %s425_s14 }
  0x1b   : > { %p1450_p13 = pnand %p1133_p10, %p1424_p5  ;;  %p1091_p0 = scmp.ge.s32.totalorder %s1302_s16, 1 }
  0x1c   : > { %p433_p1 = scmp.lt.s32.totalorder %s1302_s16, 3  ;;  %s413_s15 = scalar_lea.sflag [#allocation3], %s412_s27 }
  0x1d   : > { %p1210_p3 = pneg %p1450_p13 }
  0x20   : > { %s422_s19 = scalar_lea.hbm %s1631_s0, %s1118_s28  ;;  %s1213_s23 = scalar_lea.hbm %s1631_s0, 64 }
  0x21   : > { %s423_s29 = sshll.u32 %s422_s19, 4  ;;  %s424_s29 = int_to_ptr.hbm [resolvable:$true] %s423_s29 }
  0x22   : > { %s1206_s26 = sshra.s32 %s424_s29, 4  ;;  %s1207_s26 = int_to_ptr.hbm [resolvable:$true] %s1206_s26 }
  0x23   : > { %s1208_s25 = scalar_lea.hbm %s1207_s26, 32  ;;  %p1214_p5 = scmp.lt.s32.totalorder %s1207_s26, %s1631_s0 }
  0x24   : > { %p1209_p2 = scmp.ne.s32.totalorder %s1207_s26, %s1208_s25  ;;  %p1215_p8 = scmp.lt.s32.totalorder %s1213_s23, %s1208_s25 }
  0x26   : > { %p1211_p4 = pnand %p1210_p3, %p1209_p2  ;;  %p1216_p10 = por %p1215_p8, %p1214_p5 }
  0x28   : > { %p1212_p7 = pneg %p1211_p4 }
  0x2a   : > { %p1217_p9 = pnand %p1216_p10, %p1212_p7 }
  0x2c   : > { %1220 = shalt.err (!%p1217_p9)
}
  0x2d   : > { %s1304_s27 = smov 256   ;;  %s1305_s21 = smov 16  }
  0x2e   : > { %1128 = dma.hbm_to_vmem [thread:$0]  (!%p1450_p13), %s424_s29, 512, %s426_s14, %s413_s15, %s1304_s27, %s1304_s27, %s1305_s21  }
  0x2f   : > { %p434_p2 = pnand %p1091_p0, %p433_p1 }
  0x30   : > { %s1471_s18 = sand.u32 (!%p434_p2), 1, %s1294_s30  }
  0x31   : > { %437 = sbr.rel (%p434_p2) target bundleno = 1484 (0x5cc), region = 76  ;;  %s1092_s25 = sshll.u32 (!%p434_p2), %s1471_s18, 5 }
  0x32   : > { %s440_s26 = scalar_lea.sflag (!%p434_p2), [#allocation3], %s1471_s18  ;;  %s443_s19 = scalar_lea.vmem (!%p434_p2), [#allocation2], %s1092_s25 }
  0x36   : > { %1281 = dma.done.wait (%p1428_p6), %s440_s26, 512  }
  0x37   : > { %1283 = vsyncadd (%p1428_p6), %s440_s26, 4294966784  ;;  %vm494_vm0 = vcmask 64512   ;;  %v1481_v0 = vld [vmem:[%s443_s19] sm:$0xff]  ;;  %v1483_v1 = vld [vmem:[%s443_s19 + $0x8] sm:$0xff]  ;;  %s1633_s1 = sld [smem:[#allocation16_spill]]  ;;  %vm538_vm1 = vcmask 1040384  }
  0x38   : > { %513 = vmatpush.msra.mxu0 %v1481_v0  ;;  %533 = vmatpush.msra.mxu1 %v1483_v1  ;;  %v1490_v3 = vld [vmem:[%s443_s19 + $0x10] sm:$0xff]  ;;  %v1492_v4 = vld [vmem:[%s443_s19 + $0x18] sm:$0xff]  ;;  %v789_v45 = vld [vmem:[%s1601_s8] sm:$0xff]  ;;  %vm660_vm10 = vcmask 7168   ;;  %vm722_vm11 = vcmask 25600   ;;  %vm765_vm12 = vcmask 1043456  }
  0x39   : > { %596 = vmatpush.msra.mxu2 %v1490_v3  ;;  %616 = vmatpush.msra.mxu3 %v1492_v4  ;;  %v694_v46 = vld [vmem:[%s1595_s2] sm:$0xff]  ;;  %s1634_s14 = sld [smem:[#allocation10_spill]]  ;;  %s488_s23 = scalar_lea.vmem [#allocation5], %s1092_s25 }
  0x3a   : > { %717 = vmatpush.msrb.mxu0 %v694_v46  ;;  %s1635_s24 = sld [smem:[#allocation17_spill]]  ;;  %s1008_s28 = sshll.u32 %s488_s23, 4  ;;  %s1009_s28 = int_to_ptr.vmem [resolvable:$true] %s1008_s28 }
  0x3b   : > { %809 = vmatpush.msrb.mxu2 %v789_v45  ;;  %s995_s21 = scalar_lea.sflag [#allocation4], %s1471_s18 }
  0x3d   : > { %v491_v2 = vld [vmem:[%s1633_s1] sm:$0x1] }
  0x3e   : > { %1094 = vmatmul.msk.f32.vlgmr.msra.gmra.mxu0 %vm494_vm0, %v491_v2  ;;  %1095 = vmatmul.msk.f32.vlgmr.msra.gmra.mxu1 %vm494_vm0, %v491_v2 }
  0x3f   : > { %1098 = vmatmul.msk.f32.vlgmr.msra.gmra.mxu2 %vm494_vm0, %v491_v2  ;;  %1099 = vmatmul.msk.f32.vlgmr.msra.gmra.mxu3 %vm494_vm0, %v491_v2  ;;  %s1120_s29 = sshll.u32 %s1634_s14, 5 }
  0x40   : > { %s1007_s22 = scalar_lea.hbm %s1635_s24, %s1120_s29  ;;  %s1256_s29 = scalar_lea.hbm %s1635_s24, 64 }
  0x41   : > { %s1010_s27 = sshll.u32 %s1007_s22, 4  ;;  %s1011_s27 = int_to_ptr.hbm [resolvable:$true] %s1010_s27 }
  0x42   : > { %s1250_s26 = sshra.s32 %s1011_s27, 4  ;;  %s1251_s26 = int_to_ptr.hbm [resolvable:$true] %s1250_s26 }
  0x43   : > { %s1252_s25 = scalar_lea.hbm %s1251_s26, 32  ;;  %p1257_p0 = scmp.lt.s32.totalorder %s1251_s26, %s1635_s24 }
  0x44   : > { %p1253_p6 = scmp.ne.s32.totalorder %s1251_s26, %s1252_s25  ;;  %p1258_p1 = scmp.lt.s32.totalorder %s1256_s29, %s1252_s25 }
  0x46   : > { %p1254_p9 = pnand %p1253_p6, %p1435_p11  ;;  %p1259_p3 = por %p1258_p1, %p1257_p0 }
  0x48   : > { %p1255_p13 = pneg %p1254_p9 }
  0x4a   : > { %p1260_p4 = pnand %p1259_p3, %p1255_p13 }
  0xbb   : > { %v515_v5 = vpop.f32.mrf.mxu0  ;;  %v535_v6 = vpop.f32.mrf.mxu1 }
  0xbc   : > { %v539_v7 = vsel %vm538_vm1, %v515_v5, -inf  ;;  %v540_v8 = vsel %vm538_vm1, %v535_v6, -inf }
  0xbd   : > { %v541_v9 = vmax.f32 %v539_v7, %v540_v8 }
  0xbf   : > { %542 = vmax.xlane.f32.xlu0 %v541_v9 }
  0xc2   : > { %v598_v10 = vpop.f32.mrf.mxu2  ;;  %v618_v11 = vpop.f32.mrf.mxu3 }
  0xc3   : > { %v621_v12 = vsel %vm538_vm1, %v598_v10, -inf  ;;  %v622_v13 = vsel %vm538_vm1, %v618_v11, -inf }
  0xc4   : > { %v623_v14 = vmax.f32 %v621_v12, %v622_v13 }
  0xc7   : > { %624 = vmax.xlane.f32.xlu0 %v623_v14 }
 0x132   : > { %v543_v15 = vpop.xlane.xlu0 %542 }
 0x133   : > { %v544_v16 = vsub.f32 %v515_v5, %v543_v15  ;;  %v545_v17 = vsub.f32 %v535_v6, %v543_v15 }
 0x135   : > { %v546_v18 = vmul.f32 1.442695, %v544_v16  ;;  %v548_v19 = vmul.f32 1.442695, %v545_v17  ;;  %v1178_v17 = vld [vmem:[%s1596_s3] ss:$0 sm:$0xff] }
 0x137   : > { %1186 = vpow2.f32 %v546_v18 }
 0x138   : > { %1188 = vpow2.f32 %v548_v19 }
 0x13a   : > { %v625_v20 = vpop.xlane.xlu0 %624 }
 0x13b   : > { %v626_v21 = vsub.f32 %v598_v10, %v625_v20  ;;  %v627_v22 = vsub.f32 %v618_v11, %v625_v20 }
 0x13d   : > { %v1187_v23 = vpop.eup %1186  ;;  %v628_v24 = vmul.f32 1.442695, %v626_v21  ;;  %v630_v25 = vmul.f32 1.442695, %v627_v22  ;;  %v1179_v21 = vld [vmem:[%s1602_s9] ss:$0 sm:$0xff] }
 0x13e   : > { %v1189_v26 = vpop.eup %1188  ;;  %v550_v27 = vsel %vm538_vm1, %v1187_v23, 0.0  ;;  %v569_v28 = vperm.slane %v1187_v23, 0 }
 0x13f   : > { %1190 = vpow2.f32 %v628_v24  ;;  %v551_v29 = vsel %vm538_vm1, %v1189_v26, 0.0  ;;  %v570_v30 = vperm.slane %v1189_v26, 0 }
 0x140   : > { %1192 = vpow2.f32 %v630_v25  ;;  %v552_v31 = vadd.f32 %v551_v29, %v550_v27  ;;  %v571_v32 = vmul.f32 %v569_v28, %v1481_v0 }
 0x141   : > { %v572_v33 = vmul.f32 %v570_v30, %v1483_v1 }
 0x142   : > { %553 = vadd.xlane.f32.xlu1 %v552_v31 }
 0x143   : > { %v573_v34 = vadd.f32 %v572_v33, %v571_v32 }
 0x145   : > { %v1191_v35 = vpop.eup %1190  ;;  %574 = vadd.xlane.f32.xlu2 %v573_v34 }
 0x146   : > { %v1193_v36 = vpop.eup %1192  ;;  %v632_v37 = vsel %vm538_vm1, %v1191_v35, 0.0  ;;  %v651_v38 = vperm.slane %v1191_v35, 0  ;;  %v847_v35 = vld [vmem:[%s1605_s12] sm:$0xf] }
 0x147   : > { %v633_v39 = vsel %vm538_vm1, %v1193_v36, 0.0  ;;  %v652_v40 = vperm.slane %v1193_v36, 0  ;;  %v756_v36 = vld [vmem:[%s1599_s6] sm:$0xf]  ;;  %1104 = vmatpush.msk.msrb.mxu3 %vm765_vm12, %v847_v35 }
 0x148   : > { %v634_v41 = vadd.f32 %v633_v39, %v632_v37  ;;  %v653_v42 = vmul.f32 %v1490_v3, %v651_v38  ;;  %1101 = vmatpush.msk.msrb.mxu1 %vm765_vm12, %v756_v36 }
 0x149   : > { %v654_v43 = vmul.f32 %v1492_v4, %v652_v40 }
 0x14a   : > { %635 = vadd.xlane.f32.xlu1 %v634_v41 }
 0x14b   : > { %v655_v44 = vadd.f32 %v654_v43, %v653_v42 }
 0x14d   : > { %656 = vadd.xlane.f32.xlu2 %v655_v44 }
 0x1b5   : > { %v554_v47 = vpop.xlane.xlu1 %553 }
 0x1b6   : > { %1194 = vrcp.f32 %v554_v47  ;;  %v566_v55 = vand.u32 2147483648, %v554_v47  ;;  %vm560_vm3 = vweird.f32 %v554_v47  ;;  %v564_v56 = vand.u32 2147483647, %v554_v47 }
 0x1b8   : > { %v575_v58 = vpop.xlane.xlu2 %574  ;;  %v567_v61 = vor.u32 1.1754944e-38, %v566_v55  ;;  %vm565_vm5 = vcmp.eq.f32.partialorder %v564_v56, 8.507059e+37  ;;  %v1181_v56 = vld [vmem:[%s1598_s5] ss:$0 sm:$0xff] }
 0x1bc   : > { %v1195_v48 = vpop.eup %1194 }
 0x1bd   : > { %v556_v49 = vmul.f32 %v1195_v48, %v554_v47  ;;  %v636_v50 = vpop.xlane.xlu1 %635  ;;  %vm561_vm2 = vweird.f32 %v1195_v48 }
 0x1be   : > { %1196 = vrcp.f32 %v636_v50  ;;  %vm562_vm4 = vmor %vm560_vm3, %vm561_vm2  ;;  %v648_v62 = vand.u32 2147483648, %v636_v50  ;;  %v646_v2 = vand.u32 2147483647, %v636_v50  ;;  %vm642_vm7 = vweird.f32 %v636_v50 }
 0x1bf   : > { %v557_v51 = vsub.f32 1.0, %v556_v49  ;;  %vm761_vm3 = vcmask 31744  }
 0x1c0   : > { %v649_v7 = vor.u32 1.1754944e-38, %v648_v62  ;;  %vm647_vm9 = vcmp.eq.f32.partialorder %v646_v2, 8.507059e+37  ;;  %v657_v12 = vpop.xlane.xlu2 %656 }
 0x1c1   : > { %v558_v52 = vmul.f32 %v1195_v48, %v557_v51 }
 0x1c3   : > { %v559_v53 = vadd.f32 %v1195_v48, %v558_v52  ;;  %v1180_v52 = vld [vmem:[%s1597_s4] ss:$0 sm:$0xff] }
 0x1c4   : > { %v1197_v54 = vpop.eup %1196 }
 0x1c5   : > { %v638_v57 = vmul.f32 %v1197_v54, %v636_v50  ;;  %v563_v59 = vsel %vm562_vm4, %v1195_v48, %v559_v53  ;;  %vm643_vm6 = vweird.f32 %v1197_v54 }
 0x1c6   : > { %v568_v5 = vsel %vm565_vm5, %v567_v61, %v563_v59  ;;  %vm644_vm8 = vmor %vm642_vm7, %vm643_vm6  ;;  %v1182_v61 = vld [vmem:[%s1603_s10] ss:$0 sm:$0xff] }
 0x1c7   : > { %v639_v60 = vsub.f32 1.0, %v638_v57  ;;  %v576_v8 = vperm.slane %v568_v5, 0  ;;  %v1183_v5 = vld [vmem:[%s1604_s11] ss:$0 sm:$0xff] }
 0x1c9   : > { %v640_v63 = vmul.f32 %v1197_v54, %v639_v60  ;;  %v577_v13 = vmul.f32 %v576_v8, %v575_v58 }
 0x1cb   : > { %v641_v6 = vadd.f32 %v1197_v54, %v640_v63 }
 0x1cd   : > { %v645_v9 = vsel %vm644_vm8, %v1197_v54, %v641_v6 }
 0x1ce   : > { %v650_v10 = vsel %vm647_vm9, %v649_v7, %v645_v9  ;;  %v1184_v9 = vld [vmem:[%s1600_s7] ss:$0 sm:$0xff] }
 0x1cf   : > { %v658_v11 = vperm.slane %v650_v10, 0 }
 0x1d1   : > { %v659_v14 = vmul.f32 %v658_v11, %v657_v12  ;;  %v1185_v12 = vld [vmem:[%s1606_s13] ss:$0 sm:$0xff] }
 0x1d3   : > { %v661_v15 = vsel %vm660_vm10, %v577_v13, %v659_v14  ;;  %v1306_v14 = vmov 0  }
 0x1d4   : > { %662 = vxpose.xlu0.b32.start.end [1/1] (short) (narrow) %v661_v15, 8 }
 0x23b   : > { %1174 = vset.pattern.permute.xlu0 %v1306_v14 }
 0x278   : > { %v678_v16 = vpop.trf.xlu0 }
 0x279   : > { %1100 = vmatmul.msk.f32.vlgmr.msrb.gmra.mxu0 %vm494_vm0, %v678_v16  ;;  %1103 = vmatmul.msk.f32.vlgmr.msrb.gmra.mxu2 %vm494_vm0, %v678_v16 }
 0x2f6   : > { %v719_v18 = vpop.f32.mrf.mxu0 }
 0x2f7   : > { %v720_v19 = vadd.f32 %v1178_v17, %v719_v18 }
 0x2f9   : > { %v723_v20 = vsel %vm722_vm11, %v720_v19, 0.0 }
 0x2fa   : > { %724 = vadd.xlane.f32.xlu2 %v723_v20 }
 0x2fc   : > { %v811_v22 = vpop.f32.mrf.mxu2 }
 0x2fd   : > { %v812_v23 = vadd.f32 %v1179_v21, %v811_v22 }
 0x2ff   : > { %v814_v24 = vsel %vm722_vm11, %v812_v23, 0.0 }
 0x300   : > { %815 = vadd.xlane.f32.xlu1 %v814_v24 }
 0x36d   : > { %v725_v25 = vpop.xlane.xlu2 %724 }
 0x36e   : > { %v726_v26 = vmul.f32 0.25, %v725_v25 }
 0x370   : > { %v727_v27 = vsub.f32 %v720_v19, %v726_v26 }
 0x372   : > { %v728_v28 = vmul.f32 %v727_v27, %v727_v27 }
 0x373   : > { %v816_v29 = vpop.xlane.xlu1 %815 }
 0x374   : > { %v817_v30 = vmul.f32 0.25, %v816_v29  ;;  %v729_v31 = vsel %vm722_vm11, %v728_v28, 0.0  ;;  %v1307_v29 = vmov 1  }
 0x375   : > { %730 = vadd.xlane.f32.xlu2 %v729_v31 }
 0x376   : > { %v818_v32 = vsub.f32 %v812_v23, %v817_v30 }
 0x378   : > { %v819_v33 = vmul.f32 %v818_v32, %v818_v32 }
 0x37a   : > { %v820_v34 = vsel %vm722_vm11, %v819_v33, 0.0 }
 0x37b   : > { %821 = vadd.xlane.f32.xlu1 %v820_v34 }
 0x3e8   : > { %v731_v37 = vpop.xlane.xlu2 %730 }
 0x3e9   : > { %v732_v38 = vmul.f32 0.25, %v731_v37 }
 0x3eb   : > { %v733_v39 = vadd.f32 1e-05, %v732_v38 }
 0x3ed   : > { %1198 = vrsqrt.f32 %v733_v39  ;;  %vm740_vm14 = vweird.f32 %v733_v39 }
 0x3ee   : > { %v822_v40 = vpop.xlane.xlu1 %821 }
 0x3ef   : > { %v823_v41 = vmul.f32 0.25, %v822_v40 }
 0x3f1   : > { %v824_v42 = vadd.f32 1e-05, %v823_v41 }
 0x3f3   : > { %v1199_v43 = vpop.eup %1198  ;;  %1200 = vrsqrt.f32 %v824_v42  ;;  %vm831_vm1 = vweird.f32 %v824_v42 }
 0x3f4   : > { %v735_v44 = vmul.f32 %v1199_v43, %v733_v39  ;;  %vm741_vm13 = vweird.f32 %v1199_v43 }
 0x3f5   : > { %vm742_vm15 = vmor %vm740_vm14, %vm741_vm13 }
 0x3f6   : > { %v736_v45 = vmul.f32 %v1199_v43, %v735_v44 }
 0x3f8   : > { %v737_v46 = vmul.f32 0.5, %v736_v45 }
 0x3f9   : > { %v1201_v47 = vpop.eup %1200 }
 0x3fa   : > { %v738_v48 = vsub.f32 1.5, %v737_v46  ;;  %v826_v49 = vmul.f32 %v1201_v47, %v824_v42  ;;  %vm832_vm0 = vweird.f32 %v1201_v47 }
 0x3fb   : > { %vm833_vm2 = vmor %vm831_vm1, %vm832_vm0 }
 0x3fc   : > { %v739_v50 = vmul.f32 %v1199_v43, %v738_v48  ;;  %v827_v51 = vmul.f32 %v1201_v47, %v826_v49 }
 0x3fe   : > { %v743_v53 = vsel %vm742_vm15, %v1199_v43, %v739_v50  ;;  %v828_v54 = vmul.f32 0.5, %v827_v51 }
 0x3ff   : > { %v744_v55 = vmul.f32 %v743_v53, %v727_v27 }
 0x400   : > { %v829_v57 = vsub.f32 1.5, %v828_v54 }
 0x401   : > { %v749_v58 = vmul.f32 %v1180_v52, %v744_v55 }
 0x402   : > { %v830_v59 = vmul.f32 %v1201_v47, %v829_v57 }
 0x403   : > { %v754_v60 = vadd.f32 %v1181_v56, %v749_v58 }
 0x404   : > { %v834_v62 = vsel %vm833_vm2, %v1201_v47, %v830_v59 }
 0x405   : > { %v835_v63 = vmul.f32 %v834_v62, %v818_v32  ;;  %v755_v2 = vmax.f32 %v754_v60, 0.0 }
 0x407   : > { %1102 = vmatmul.msk.f32.vlgmr.msrb.gmra.mxu1 %vm761_vm3, %v755_v2  ;;  %v840_v6 = vmul.f32 %v1182_v61, %v835_v63 }
 0x409   : > { %v845_v7 = vadd.f32 %v1183_v5, %v840_v6 }
 0x40b   : > { %v846_v8 = vmax.f32 %v845_v7, 0.0 }
 0x40d   : > { %1105 = vmatmul.msk.f32.vlgmr.msrb.gmra.mxu3 %vm761_vm3, %v846_v8 }
 0x484   : > { %v786_v10 = vpop.f32.mrf.mxu1 }
 0x485   : > { %v787_v11 = vadd.f32 %v1184_v9, %v786_v10 }
 0x487   : > { %897 = vxpose.xlu1.b32.start.end [1/1] (short) (narrow) %v787_v11, 8 }
 0x490   : > { %v875_v13 = vpop.f32.mrf.mxu3 }
 0x491   : > { %v876_v15 = vadd.f32 %v1185_v12, %v875_v13 }
 0x493   : > { %v1106_v16 = vmul.f32 -1.442695, %v876_v15 }
 0x495   : > { %1202 = vpow2.f32 %v1106_v16 }
 0x49b   : > { %v1203_v17 = vpop.eup %1202 }
 0x49c   : > { %v881_v18 = vadd.f32 1.0, %v1203_v17 }
 0x49e   : > { %1204 = vrcp.f32 %v881_v18  ;;  %v893_v22 = vand.u32 2147483648, %v881_v18  ;;  %v891_v24 = vand.u32 2147483647, %v881_v18  ;;  %vm887_vm5 = vweird.f32 %v881_v18 }
 0x4a0   : > { %v894_v26 = vor.u32 1.1754944e-38, %v893_v22  ;;  %vm892_vm7 = vcmp.eq.f32.partialorder %v891_v24, 8.507059e+37 }
 0x4a4   : > { %v1205_v19 = vpop.eup %1204 }
 0x4a5   : > { %v883_v20 = vmul.f32 %v1205_v19, %v881_v18  ;;  %vm888_vm4 = vweird.f32 %v1205_v19 }
 0x4a6   : > { %vm889_vm6 = vmor %vm887_vm5, %vm888_vm4 }
 0x4a7   : > { %v884_v21 = vsub.f32 1.0, %v883_v20 }
 0x4a9   : > { %v885_v23 = vmul.f32 %v1205_v19, %v884_v21 }
 0x4ab   : > { %v886_v25 = vadd.f32 %v1205_v19, %v885_v23 }
 0x4ad   : > { %v890_v27 = vsel %vm889_vm6, %v1205_v19, %v886_v25 }
 0x4ae   : > { %v895_v28 = vsel %vm892_vm7, %v894_v26, %v890_v27 }
 0x4af   : > { %929 = vxpose.xlu2.b32.start.end [1/1] (short) (narrow) %v895_v28, 8 }
 0x4da   : > { %1176 = vset.pattern.permute.xlu1 %v1306_v14 }
 0x511   : > { %1175 = vset.pattern.permute.xlu2 %v1307_v29 }
 0x52b   : > { %v913_v30 = vpop.trf.xlu1 }
 0x52c   : > { %970 = vperm.xlu1 %1176, %v913_v30  }
 0x548   : > { %v945_v31 = vpop.trf.xlu2 }
 0x549   : > { %980 = vperm.xlu2 %1175, %v945_v31   ;;  %963 = vperm.xlu0 %1174, %v945_v31  }
 0x551   : > { %1177 = vset.pattern.permute.xlu0 %v1307_v29 }
 0x552   : > { %986 = vperm.xlu0 %1177, %v913_v30  }
 0x59e   : > { %v971_v33 = vpop.permute.xlu1 %970 }
 0x5a3   : > { %v981_v38 = vpop.permute.xlu2 %980 }
 0x5bb   : > { %v964_v32 = vpop.permute.xlu0 %963 }
 0x5bc   : > { %v966_v34 = vmul.f32 %v964_v32, %v1481_v0  ;;  %v967_v35 = vmul.f32 %v964_v32, %v1483_v1  ;;  %v983_v0 = vmul.f32 %v1490_v3, %v981_v38  ;;  %v984_v1 = vmul.f32 %v1492_v4, %v981_v38 }
 0x5be   : > { %v973_v36 = vadd.f32 %v971_v33, %v966_v34  ;;  %v974_v37 = vadd.f32 %v971_v33, %v967_v35 }
 0x5c0   : > { %975 = vst [vmem:[%s488_s23] sm:$0xff] %v973_v36 }
 0x5c1   : > { %976 = vst [vmem:[%s488_s23 + $0x8] sm:$0xff] %v974_v37 }
 0x5c4   : > { %v987_v39 = vpop.permute.xlu0 %986 }
 0x5c5   : > { %v989_v40 = vadd.f32 %v987_v39, %v983_v0  ;;  %v990_v41 = vadd.f32 %v987_v39, %v984_v1 }
 0x5c7   : > { %1109 = vst [vmem:[%s488_s23 + $0x10] sm:$0xff] %v989_v40 }
 0x5c8   : > { %1110 = vst [vmem:[%s488_s23 + $0x18] sm:$0xff] %v990_v41 }
 0x5c9   : > { %1263 = shalt.err (!%p1260_p4)
}
 0x5ca   : > { %s1308_s18 = smov 256   ;;  %s1309_s22 = smov 16  }
 0x5cb   : > { %1123 = dma.vmem_to_hbm [thread:$0]  (%p1435_p11), %s1009_s28, 512, %s1011_s27, %s995_s21, %s1308_s18, %s1308_s18, %s1309_s22  }
 0x5cc PF: > { %s1637_s23 = sld [smem:[#allocation8_spill]]  ;;  %p1639_p7 = scmp.ge.s32.totalorder %s1302_s16, 2 }
 0x5ce   : > { %p1130_p5 = pnand %p1639_p7, %p1439_p12 }
 0x5d0   : > { %p1131_p8 = pneg %p1130_p5 }
 0x5d2   : > { %s1025_s1 = sand.u32 1, %s1637_s23  }
 0x5d3   : > { %s1026_s19 = scalar_lea.sflag [#allocation4], %s1025_s1 }
 0x5d4   : > { %1285 = dma.done.wait (%p1131_p8), %s1026_s19, 512  }
 0x5d5   : > { %1287 = vsyncadd (%p1131_p8), %s1026_s19, 4294966784  ;;  %s1640_s16 = sld [smem:[#allocation11_spill]]  ;;  %s1643_s29 = smov %s1294_s30 }
 0x5d6   : > { %s1641_s26 = sld [smem:[#allocation9_spill]] }
 0x5d7   : > { %s1642_s15 = sld [smem:[#allocation12_spill]] }
 0x5db   : > { %p27_p10 = scmp.ge.s32.totalorder %s1640_s16, 4  }
 0x5dc   : > { %s1644_s30 = smov %s1641_s26 }
 0x5dd   :  { %29 = sbr.rel (!%p27_p10) target bundleno = 9 (0x9), region = 123 }
 0x5e2   :  { %1032 = vsyncpa [#allocation3], 1 }
 0x5e3   :  { %1034 = vsyncpa [#allocation3 + $0x1], 1 }
 0x5e4   :  { %1035 = vsyncpa [#allocation4], 1 }
 0x5e5   :  { %1037 = vsyncpa [#allocation4 + $0x1], 1 }

</bundles_post_ra>
